<compile_context>
chip_gen: v6e
topology: v6e:2x2x1
jax: 0.10.0
libtpu: 0.0.40
codegen_flags: <defaults>
</compile_context>

<pallas_src>
import jax
import jax.numpy as jnp
from jax import lax
from jax.experimental import pallas as pl
from jax.experimental.pallas import tpu as pltpu

IN_FEATURES = 38
OUT_FEATURES = 1
DEFAULT_TB = 16384      # rows per tile; multiple of 128
MAX_TB = 32768          # keeps double-buffered footprint under the VMEM cap
VMEM_CAP = 48 << 20     # stay well under v7x's 64 MiB physical VMEM per TC


def linear_kernel(x_ref, w_ref, b_ref, o_ref):
    # x_ref: (TB, 38) VMEM tile of activations (rows of the batch)
    # w_ref: (1, 38)  VMEM weight row (W^T), resident across the grid
    # b_ref: (1, 1)   SMEM scalar bias
    # o_ref: (1, TB)  VMEM tile -- batch along LANES (lane-dense output)
    #
    # y[0, i] = sum_k w[0, k] * x[i, k]   (flash-attention-style Q @ K^T
    # contraction of both minor dims) -> MXU result is lane-dense in i.
    acc = lax.dot_general(
        w_ref[...], x_ref[...],
        dimension_numbers=(((1,), (1,)), ((), ())),
        preferred_element_type=jnp.float32,
    )                                            # (1, TB) f32
    o_ref[...] = (acc + b_ref[0, 0]).astype(o_ref.dtype)


def lr_forward(x, w, b, *, tb=DEFAULT_TB, lane_major_output=False,
               core_parallel=False):
    """y = x @ w + b  (equivalent to PyTorch nn.Linear(38, 1) forward).

    x: (B, 38), w: (38, 1) (transposed nn.Linear weight), b: (1,).
    Returns (B, 1) by default (nn.Linear semantics).  Pass
    lane_major_output=True to get the raw lane-dense (B,) result and avoid
    re-materializing a lane-padded (B, 1) HBM array downstream.
    On TPU v7x, pass core_parallel=True to shard the batch grid across both
    TensorCores (do not use on single-TC v5e/v6e).
    """
    B = x.shape[0]
    tb = min(int(tb), MAX_TB)
    if B <= tb:
        TB = B                                   # single tile: full-array block
    else:
        TB = max(128, (tb // 128) * 128)         # lane/sublane aligned tile
    grid = (pl.cdiv(B, TB),)

    w_row = w.reshape(1, IN_FEATURES).astype(jnp.float32)   # (1, 38) = W^T
    b2d = b.reshape(1, 1).astype(jnp.float32)

    # Double-buffered VMEM footprint:
    #   x tile   (TB, 38) f32, lanes padded 38->128 -> TB*512 B per buffer
    #   out tile (1, TB)  f32, sublanes padded 1->8 -> TB*32  B per buffer
    # plus resident weight row / bias / compiler scratch headroom.
    sem = pltpu.CORE_PARALLEL if core_parallel else "parallel"
    cp_kwargs = dict(dimension_semantics=(sem,))
    vmem_needed = 2 * TB * 512 + 2 * TB * 32 + (2 << 20)
    if vmem_needed > (16 << 20):   # 16 MiB = smallest default scoped limit (v5e)
        cp_kwargs["vmem_limit_bytes"] = min(vmem_needed + (4 << 20), VMEM_CAP)

    y_row = pl.pallas_call(
        linear_kernel,
        out_shape=jax.ShapeDtypeStruct((1, B), x.dtype),
        grid_spec=pltpu.PrefetchScalarGridSpec(
            num_scalar_prefetch=0,
            grid=grid,
            in_specs=[
                pl.BlockSpec((TB, IN_FEATURES), lambda i: (i, 0)),
                pl.BlockSpec((1, IN_FEATURES), lambda i: (0, 0)),
                pl.BlockSpec(memory_space=pltpu.MemorySpace.SMEM),
            ],
            out_specs=pl.BlockSpec((1, TB), lambda i: (0, i)),
        ),
        compiler_params=pltpu.CompilerParams(**cp_kwargs),
    )(x, w_row, b2d)

    if lane_major_output:
        return y_row[0]                          # (B,)
    # Reshape only to preserve nn.Linear's (B, 1) output contract.
    return y_row.reshape(B, OUT_FEATURES)


if __name__ == "__main__":
    key = jax.random.PRNGKey(0)
    kx, kw, kb, kx2 = jax.random.split(key, 4)

    # Deterministic parameter init (PyTorch-style uniform(-bound, bound)).
    bound = 1.0 / (IN_FEATURES ** 0.5)
    w = jax.random.uniform(
        kw, (IN_FEATURES, OUT_FEATURES), dtype=jnp.float32,
        minval=-bound, maxval=bound)
    b = jax.random.uniform(
        kb, (OUT_FEATURES,), dtype=jnp.float32, minval=-bound, maxval=bound)

    # Case 1: small single-tile batch (B=8).
    B = 8
    x = jax.random.normal(kx, (B, IN_FEATURES), dtype=jnp.float32)
    y = lr_forward(x, w, b)
    jax.block_until_ready(y)
    y_ref = x @ w + b.reshape(1, OUT_FEATURES)
    assert y.shape == (B, OUT_FEATURES)
    assert jnp.allclose(y, y_ref, atol=1e-4, rtol=1e-4)

    # Case 2: multi-tile batch with a partial last tile
    # (B=300, tb=128 -> grid of 3 steps, last tile padded/discarded).
    B2 = 300
    x2 = jax.random.normal(kx2, (B2, IN_FEATURES), dtype=jnp.float32)
    y2 = lr_forward(x2, w, b, tb=128)
    jax.block_until_ready(y2)
    y2_ref = x2 @ w + b.reshape(1, OUT_FEATURES)
    assert y2.shape == (B2, OUT_FEATURES)
    assert jnp.allclose(y2, y2_ref, atol=1e-4, rtol=1e-4)

    # Case 3: lane-dense output path (what downstream consumers should use).
    y3 = lr_forward(x2, w, b, tb=128, lane_major_output=True)
    jax.block_until_ready(y3)
    assert y3.shape == (B2,)
    assert jnp.allclose(y3, y2_ref[:, 0], atol=1e-4, rtol=1e-4)

    print("KERNEL_OK")
</pallas_src>

<mosaic_0001>
module attributes {stable_mosaic.version = 11 : i64} {
  func.func @linear_kernel(%arg0: i32, %arg1: memref<8x38xf32, #tpu.memory_space<vmem>>, %arg2: memref<1x38xf32, #tpu.memory_space<vmem>>, %arg3: memref<1x1xf32, #tpu.memory_space<smem>>, %arg4: memref<1x8xf32, #tpu.memory_space<vmem>>) attributes {dimension_semantics = [#tpu.dimension_semantics<parallel>], iteration_bounds = array<i64: 1>, scalar_prefetch = 0 : i64, scratch_operands = 0 : i64, tpu.core_type = #tpu.core_type<tc>, window_params = [{transform_indices = @transform_0, window_bounds = array<i64: 8, 38>}, {pipeline_mode = #tpu.pipeline_mode<synchronous>, transform_indices = @transform_1, window_bounds = array<i64: 1, 38>}, {transform_indices = @transform_2, window_bounds = array<i64: 1, 1>}, {transform_indices = @transform_3, window_bounds = array<i64: 1, 8>}]} {
    %c0 = arith.constant 0 : index
    %c0_0 = arith.constant 0 : index
    %0 = vector.load %arg2[%c0, %c0_0] : memref<1x38xf32, #tpu.memory_space<vmem>>, vector<1x38xf32>
    %c0_1 = arith.constant 0 : index
    %c0_2 = arith.constant 0 : index
    %1 = vector.load %arg1[%c0_1, %c0_2] : memref<8x38xf32, #tpu.memory_space<vmem>>, vector<8x38xf32>
    %cst = arith.constant dense<0.000000e+00> : vector<1x8xf32>
    %2 = tpu.matmul %0, %1, %cst {dimension_numbers = #tpu.dot_dimension_numbers<[1], [1], [0], [0], [0, 0, 1, 0], [], []>} : vector<1x38xf32>, vector<8x38xf32>, vector<1x8xf32> -> vector<1x8xf32>
    %c0_3 = arith.constant 0 : index
    %c0_4 = arith.constant 0 : index
    %3 = memref.load %arg3[%c0_3, %c0_4] : memref<1x1xf32, #tpu.memory_space<smem>>
    %4 = vector.broadcast %3 : f32 to vector<1x8xf32>
    %5 = arith.addf %2, %4 : vector<1x8xf32>
    %c0_5 = arith.constant 0 : index
    %c0_6 = arith.constant 0 : index
    %6 = vector.load %arg4[%c0_5, %c0_6] : memref<1x8xf32, #tpu.memory_space<vmem>>, vector<1x8xf32>
    tpu.vector_store %arg4[%c0_5, %c0_6], %5 {strides = array<i32>} : memref<1x8xf32, #tpu.memory_space<vmem>>, vector<1x8xf32>,
    return
  }
  func.func @transform_0(%arg0: i32) -> (i32, i32) {
    %c0_i32 = arith.constant 0 : i32
    %c0_i32_0 = arith.constant 0 : i32
    return %arg0, %c0_i32 : i32, i32
  }
  func.func @transform_1(%arg0: i32) -> (i32, i32) {
    %c0_i32 = arith.constant 0 : i32
    %c0_i32_0 = arith.constant 0 : i32
    %c0_i32_1 = arith.constant 0 : i32
    return %c0_i32, %c0_i32_0 : i32, i32
  }
  func.func @transform_2(%arg0: i32) -> (i32, i32) {
    %c0_i32 = arith.constant 0 : i32
    %c0_i32_0 = arith.constant 0 : i32
    %c0_i32_1 = arith.constant 0 : i32
    return %c0_i32, %c0_i32_0 : i32, i32
  }
  func.func @transform_3(%arg0: i32) -> (i32, i32) {
    %c0_i32 = arith.constant 0 : i32
    %c0_i32_0 = arith.constant 0 : i32
    return %c0_i32, %arg0 : i32, i32
  }
}

</mosaic_0001>

<bundles_post_ra>
// kernel: tpu_custom_call.1
= control target key start
LH: loop header
LB: loop body
LE: loop exit
PB: predicated region body
PF: predicated region fallthrough
CT: control target
= control target key end

     0   :  { %9 = vsyncpa [#allocation4], 0  ;;  %s219_s0 = inlined_call_operand.hbm [shape: f32[8,38], index: 0, kind: input, shape index: {}]   ;;  %s220_s1 = inlined_call_operand.vmem [shape: f32[1,38], index: 1, kind: input, shape index: {}]   ;;  %s221_s2 = inlined_call_operand.<no memory space> [shape: f32[1,1], index: 2, kind: input, shape index: {}]   ;;  %s222_s3 = inlined_call_operand.hbm [shape: f32[1,8], index: 3, kind: output, shape index: {}]  }
   0x1   :  { %10 = vsyncpa [#allocation5], 0  ;;  %s183_s12 = smov [#allocation3]  }
   0x2   :  { %s17_s13 = sshll.u32 %s183_s12, 4  ;;  %s18_s13 = int_to_ptr.vmem [resolvable:$true] %s17_s13 }
   0x3   :  { %s147_s14 = scalar_lea.vmem %s18_s13, 128  ;;  %p152_p1 = scmp.lt.s32.totalorder %s18_s13, %s18_s13 }
   0x4   :  { %p148_p0 = scmp.ne.s32.totalorder %s18_s13, %s147_s14  ;;  %p153_p2 = scmp.lt.s32.totalorder %s147_s14, %s147_s14 }
   0x6   :  { %p154_p3 = por %p153_p2, %p152_p1 }
   0x8   :  { %p155_p4 = pnand %p154_p3, %p148_p0 }
   0xa   :  { %158 = shalt.err (!%p155_p4)
}
   0xb   :  { %20 = dma.hbm_to_vmem [thread:$0]  %s219_s0, 128, %s18_s13, [#allocation4]  }
   0xc   :  { %179 = dma.done.wait [#allocation4], 128  }
   0xd   :  { %180 = vsyncadd [#allocation4], 4294967168  ;;  %v184_v0 = vmov 0.0   ;;  %vm185_vm0 = vmmov 0   ;;  %vm32_vm1 = vcmask 310272   ;;  %v29_v1 = vld [vmem:[#allocation3] sm:$0xff]  ;;  %v31_v3 = vstv %s221_s2 }
   0xe   :  { %130 = vmatprep.subr.mxu0 %v184_v0  ;;  %132 = vmatprep.mubr.msk.f32.mxu0 %vm185_vm0, %v184_v0  ;;  %v28_v2 = vld [vmem:[%s220_s1] sm:$0x1]  ;;  %s186_s21 = smov [#allocation6]   ;;  %vm109_vm2 = vcmask 57344  }
   0xf   :  { %131 = vmatpush3.xpose.msk.msra.mxu0 %vm32_vm1, %v29_v1  ;;  %s117_s0 = sshll.u32 %s186_s21, 4  ;;  %s118_s0 = int_to_ptr.vmem [resolvable:$true] %s117_s0 }
  0x10   :  { %s159_s22 = scalar_lea.vmem %s118_s0, 16  ;;  %s163_s23 = scalar_lea.vmem %s118_s0, 32 }
  0x11   :  { %p160_p5 = scmp.ne.s32.totalorder %s118_s0, %s159_s22  ;;  %p164_p6 = scmp.lt.s32.totalorder %s118_s0, %s118_s0 }
  0x12   :  { %133 = vmatmul.mubr.msk.f32.vlgmr.msra.gmra.mxu0 %vm32_vm1, %v28_v2  ;;  %p165_p7 = scmp.lt.s32.totalorder %s163_s23, %s159_s22 }
  0x14   :  { %p166_p8 = por %p165_p7, %p164_p6 }
  0x16   :  { %p167_p9 = pnand %p166_p8, %p160_p5 }
  0xd2   :  { %v105_v4 = vpop.f32.mrf.mxu0 }
  0xd3   :  { %v106_v5 = vadd.f32 %v105_v4, %v31_v3 }
  0xd4   :  { %v134_v6 = vpop.f32.mrf.mxu0 }
  0xd5   :  { %110 = vst.msk [vmem:[#allocation6] sm:$0x1] %vm109_vm2, %v106_v5 }
  0xd6   :  { %170 = shalt.err (!%p167_p9)
}
  0xd7   :  { %120 = dma.vmem_to_hbm [thread:$0]  %s118_s0, 16, %s222_s3, [#allocation5]  }
  0xd8   :  { %181 = dma.done.wait [#allocation5], 16  }
  0xd9   :  { %182 = vsyncadd [#allocation5], 4294967280 }
  0xda   :  { %124 = vsyncpa [#allocation4], 1 }
  0xdb   :  { %125 = vsyncpa [#allocation5], 1 }

</bundles_post_ra>
